<compile_context>
chip_gen: v6e
topology: v6e:2x2x1
jax: 0.10.0
libtpu: 0.0.40
codegen_flags: <defaults>
</compile_context>

<pallas_src>
import jax
import jax.numpy as jnp
import numpy as np
from jax.experimental import pallas as pl
from jax.experimental.pallas import tpu as pltpu


def _make_seg_head_kernel(num_pathways, act_func):
    def kernel(*refs):
        x_refs = refs[:num_pathways]
        w_refs = refs[num_pathways:2 * num_pathways]
        b_ref = refs[2 * num_pathways]
        o_ref = refs[2 * num_pathways + 1]

        # logits: (K, ts); accumulate in f32 on the MXU; "concat" is fused
        # here as a sum of per-pathway dots.
        logits = jnp.dot(w_refs[0][...], x_refs[0][...],
                         preferred_element_type=jnp.float32)
        for p in range(1, num_pathways):
            logits = logits + jnp.dot(w_refs[p][...], x_refs[p][...],
                                      preferred_element_type=jnp.float32)
        logits = logits + b_ref[...]                    # (K, 1) -> (K, ts)

        if act_func == "softmax":
            # Softmax over the class axis (sublane axis 0); math stays f32.
            m = jnp.max(logits, axis=0, keepdims=True)
            e = jnp.exp(logits - m)
            denom = jnp.sum(e, axis=0, keepdims=True)
            out = e * pl.reciprocal(denom, approx=False)
        elif act_func == "sigmoid":
            out = jax.nn.sigmoid(logits)
        else:
            raise NotImplementedError(act_func)
        o_ref[...] = out.astype(o_ref.dtype)

    return kernel


def _pick_spatial_tile(s, max_tile):
    """Largest lane-dense spatial tile <= max_tile (full extent if s is small)."""
    if s <= max_tile:
        return s                      # block == full array dim: always legal
    for ts in (1024, 512, 256, 128):
        if ts <= max_tile and s % ts == 0:
            return ts
    return max_tile                   # non-divisible tail -> Pallas masks it


def seg_head_projection(xs, weights, bias, *, act_func="softmax", max_tile=1024):
    """Fused projection + activation on channel-major inputs.

    xs:      list of per-pathway (N, C_p, S) arrays (spatial flattened, channel-major).
    weights: list of per-pathway (K, C_p) arrays.
    bias:    (K,)
    Returns: (N, K, S)
    """
    num_pathways = len(xs)
    n, _, s = xs[0].shape
    k = weights[0].shape[0]
    dtype = xs[0].dtype

    ts = _pick_spatial_tile(s, max_tile)
    grid = (n, pl.cdiv(s, ts))

    b2d = bias.reshape(k, 1).astype(jnp.float32)

    in_specs = []
    for x in xs:
        c_p = x.shape[1]
        in_specs.append(pl.BlockSpec((None, c_p, ts), lambda ni, si: (ni, 0, si)))
    for w in weights:
        in_specs.append(pl.BlockSpec(w.shape, lambda ni, si: (0, 0)))
    in_specs.append(pl.BlockSpec((k, 1), lambda ni, si: (0, 0)))

    out_spec = pl.BlockSpec((None, k, ts), lambda ni, si: (ni, 0, si))

    # Rough VMEM need: double-buffered activation/output tiles + resident weights.
    itemsize = jnp.dtype(dtype).itemsize
    c_sum = sum(x.shape[1] for x in xs)
    vmem_est = 2 * (c_sum + k) * ts * itemsize + 2 * (c_sum + 1) * k * 4 + (1 << 20)
    vmem_limit = int(min(max(vmem_est, 32 << 20), 64 << 20))  # v7x-safe cap

    return pl.pallas_call(
        _make_seg_head_kernel(num_pathways, act_func),
        out_shape=jax.ShapeDtypeStruct((n, k, s), dtype),
        grid_spec=pltpu.PrefetchScalarGridSpec(
            num_scalar_prefetch=0,
            grid=grid,
            in_specs=in_specs,
            out_specs=out_spec,
        ),
        compiler_params=pltpu.CompilerParams(
            dimension_semantics=("parallel", "parallel"),
            vmem_limit_bytes=vmem_limit),
    )(*xs, *weights, b2d)


def resnet_seg_head_forward(inputs, pool_size, weight, bias, *, act_func="softmax"):
    """inputs: list of (N, C_p, T_p, H, W) arrays (PyTorch NCTHW convention).

    weight: (num_classes, sum(dim_in))  (PyTorch nn.Linear convention)
    bias:   (num_classes,)
    Returns (N, T', H, W, num_classes).
    """
    assert len(inputs) == len(pool_size)
    # TODO(synk): nn.Dropout (training-mode) not implemented; dropout_rate=0.0 path only.

    xs = []
    t_prime = None
    for pathway, x in enumerate(inputs):
        n, c, t, h, w = x.shape
        a = pool_size[pathway][0]
        tp = t * a
        assert t_prime is None or t_prime == tp, "pathway time extents must match"
        t_prime = tp
        # Contiguous view: (N, C, T, H, W) -> (N, C//a, T*a*H*W); no data movement.
        xs.append(x.reshape(n, c // a, tp * h * w))

    n = xs[0].shape[0]
    h, w = inputs[0].shape[3], inputs[0].shape[4]
    k = weight.shape[0]
    dtype = xs[0].dtype

    # Split the Linear weight per pathway (channel-concat order == pathway order).
    weights = []
    off = 0
    for x in xs:
        c_p = x.shape[1]
        weights.append(weight[:, off:off + c_p].astype(dtype))
        off += c_p
    assert off == weight.shape[1], "sum(dim_in) must match Linear in_features"

    out_nks = seg_head_projection(xs, weights, bias, act_func=act_func)  # (N, K, S)
    # Cheap un-transpose of the class-major output back to the layout the
    # PyTorch module returns: (N, T', H, W, K).
    return jnp.transpose(out_nks, (0, 2, 1)).reshape(n, t_prime, h, w, k)


def _reference(inputs, pool_size, weight, bias):
    pool_out = []
    for pathway, x in enumerate(inputs):
        n, c, t, h, w = x.shape
        pool_out.append(
            x.reshape(n, c // pool_size[pathway][0], t * pool_size[pathway][0], h, w)
        )
    x = jnp.concatenate(pool_out, axis=1)
    x = jnp.transpose(x, (0, 2, 3, 4, 1))
    x = jnp.einsum("nthwc,kc->nthwk", x, weight) + bias
    return jax.nn.softmax(x, axis=4)


if __name__ == "__main__":
    key = jax.random.PRNGKey(0)
    k_slow, k_fast, k_w, k_b = jax.random.split(key, 4)

    # SlowFast-style config: 2 pathways, slow pathway folds channels into time (alpha=4).
    N = 2
    num_classes = 16
    pool_size = [[4, 1, 1], [1, 1, 1]]
    # slow: (N, 16, 2, 8, 8) -> view -> (N, 4, 8, 8, 8)
    # fast: (N, 4,  8, 8, 8) -> view -> (N, 4, 8, 8, 8)
    # concat channel -> C_sum = 8  (== Linear in_features)
    x_slow = jax.random.normal(k_slow, (N, 16, 2, 8, 8), dtype=jnp.float32)
    x_fast = jax.random.normal(k_fast, (N, 4, 8, 8, 8), dtype=jnp.float32)

    c_sum = 16 // pool_size[0][0] + 4 // pool_size[1][0]  # = 8
    weight = 0.05 * jax.random.normal(k_w, (num_classes, c_sum), dtype=jnp.float32)
    bias = 0.01 * jax.random.normal(k_b, (num_classes,), dtype=jnp.float32)

    out = resnet_seg_head_forward([x_slow, x_fast], pool_size, weight, bias)
    out = jax.block_until_ready(out)

    ref = jax.block_until_ready(_reference([x_slow, x_fast], pool_size, weight, bias))
    assert out.shape == (N, 8, 8, 8, num_classes), out.shape
    np.testing.assert_allclose(np.asarray(out), np.asarray(ref), rtol=1e-5, atol=1e-5)

    print("KERNEL_OK")
</pallas_src>

<mosaic_0001>
module attributes {stable_mosaic.version = 11 : i64} {
  func.func @kernel(%arg0: i32, %arg1: i32, %arg2: memref<1x4x512xf32, #tpu.memory_space<vmem>>, %arg3: memref<1x4x512xf32, #tpu.memory_space<vmem>>, %arg4: memref<16x4xf32, #tpu.memory_space<vmem>>, %arg5: memref<16x4xf32, #tpu.memory_space<vmem>>, %arg6: memref<16x1xf32, #tpu.memory_space<vmem>>, %arg7: memref<1x16x512xf32, #tpu.memory_space<vmem>>) attributes {dimension_semantics = [#tpu.dimension_semantics<parallel>, #tpu.dimension_semantics<parallel>], iteration_bounds = array<i64: 2, 1>, scalar_prefetch = 0 : i64, scratch_operands = 0 : i64, tpu.core_type = #tpu.core_type<tc>, window_params = [{transform_indices = @transform_0, window_bounds = array<i64: 1, 4, 512>}, {transform_indices = @transform_1, window_bounds = array<i64: 1, 4, 512>}, {pipeline_mode = #tpu.pipeline_mode<synchronous>, transform_indices = @transform_2, window_bounds = array<i64: 16, 4>}, {pipeline_mode = #tpu.pipeline_mode<synchronous>, transform_indices = @transform_3, window_bounds = array<i64: 16, 4>}, {pipeline_mode = #tpu.pipeline_mode<synchronous>, transform_indices = @transform_4, window_bounds = array<i64: 16, 1>}, {transform_indices = @transform_5, window_bounds = array<i64: 1, 16, 512>}]} {
    %c0 = arith.constant 0 : index
    %c0_0 = arith.constant 0 : index
    %0 = vector.load %arg4[%c0, %c0_0] : memref<16x4xf32, #tpu.memory_space<vmem>>, vector<16x4xf32>
    %c0_1 = arith.constant 0 : index
    %c0_2 = arith.constant 0 : index
    %c0_3 = arith.constant 0 : index
    %1 = vector.load %arg2[%c0_1, %c0_2, %c0_3] : memref<1x4x512xf32, #tpu.memory_space<vmem>>, vector<1x4x512xf32>
    %2 = vector.shape_cast %1 : vector<1x4x512xf32> to vector<4x512xf32>
    %cst = arith.constant dense<0.000000e+00> : vector<16x512xf32>
    %3 = tpu.matmul %0, %2, %cst {dimension_numbers = #tpu.dot_dimension_numbers<[1], [0], [0], [1], [0, 0, 1, 1], [], []>} : vector<16x4xf32>, vector<4x512xf32>, vector<16x512xf32> -> vector<16x512xf32>
    %c0_4 = arith.constant 0 : index
    %c0_5 = arith.constant 0 : index
    %4 = vector.load %arg5[%c0_4, %c0_5] : memref<16x4xf32, #tpu.memory_space<vmem>>, vector<16x4xf32>
    %c0_6 = arith.constant 0 : index
    %c0_7 = arith.constant 0 : index
    %c0_8 = arith.constant 0 : index
    %5 = vector.load %arg3[%c0_6, %c0_7, %c0_8] : memref<1x4x512xf32, #tpu.memory_space<vmem>>, vector<1x4x512xf32>
    %6 = vector.shape_cast %5 : vector<1x4x512xf32> to vector<4x512xf32>
    %cst_9 = arith.constant dense<0.000000e+00> : vector<16x512xf32>
    %7 = tpu.matmul %4, %6, %cst_9 {dimension_numbers = #tpu.dot_dimension_numbers<[1], [0], [0], [1], [0, 0, 1, 1], [], []>} : vector<16x4xf32>, vector<4x512xf32>, vector<16x512xf32> -> vector<16x512xf32>
    %8 = arith.addf %3, %7 : vector<16x512xf32>
    %c0_10 = arith.constant 0 : index
    %c0_11 = arith.constant 0 : index
    %9 = vector.load %arg6[%c0_10, %c0_11] : memref<16x1xf32, #tpu.memory_space<vmem>>, vector<16x1xf32>
    %10 = vector.broadcast %9 : vector<16x1xf32> to vector<16x512xf32>
    %11 = arith.addf %8, %10 : vector<16x512xf32>
    %cst_12 = arith.constant dense<0xFF800000> : vector<512xf32>
    %12 = vector.multi_reduction <maximumf>, %11, %cst_12 [0] : vector<16x512xf32> to vector<512xf32>
    %13 = vector.shape_cast %12 : vector<512xf32> to vector<1x512xf32>
    %14 = vector.broadcast %13 : vector<1x512xf32> to vector<16x512xf32>
    %15 = arith.subf %11, %14 : vector<16x512xf32>
    %16 = math.exp %15 : vector<16x512xf32>
    %cst_13 = arith.constant dense<0.000000e+00> : vector<512xf32>
    %17 = vector.multi_reduction <add>, %16, %cst_13 [0] : vector<16x512xf32> to vector<512xf32>
    %18 = vector.shape_cast %17 : vector<512xf32> to vector<1x512xf32>
    %19 = tpu.reciprocal %18 : vector<1x512xf32> -> vector<1x512xf32>
    %20 = vector.broadcast %19 : vector<1x512xf32> to vector<16x512xf32>
    %21 = arith.mulf %16, %20 : vector<16x512xf32>
    %c0_14 = arith.constant 0 : index
    %c0_15 = arith.constant 0 : index
    %c0_16 = arith.constant 0 : index
    %22 = vector.load %arg7[%c0_14, %c0_15, %c0_16] : memref<1x16x512xf32, #tpu.memory_space<vmem>>, vector<1x16x512xf32>
    %23 = vector.shape_cast %22 : vector<1x16x512xf32> to vector<16x512xf32>
    %24 = vector.shape_cast %21 : vector<16x512xf32> to vector<1x16x512xf32>
    tpu.vector_store %arg7[%c0_14, %c0_15, %c0_16], %24 {strides = array<i32>} : memref<1x16x512xf32, #tpu.memory_space<vmem>>, vector<1x16x512xf32>,
    return
  }
  func.func @transform_0(%arg0: i32, %arg1: i32) -> (i32, i32, i32) {
    %c0_i32 = arith.constant 0 : i32
    %c0_i32_0 = arith.constant 0 : i32
    return %arg0, %c0_i32, %arg1 : i32, i32, i32
  }
  func.func @transform_1(%arg0: i32, %arg1: i32) -> (i32, i32, i32) {
    %c0_i32 = arith.constant 0 : i32
    %c0_i32_0 = arith.constant 0 : i32
    return %arg0, %c0_i32, %arg1 : i32, i32, i32
  }
  func.func @transform_2(%arg0: i32, %arg1: i32) -> (i32, i32) {
    %c0_i32 = arith.constant 0 : i32
    %c0_i32_0 = arith.constant 0 : i32
    %c0_i32_1 = arith.constant 0 : i32
    return %c0_i32, %c0_i32_0 : i32, i32
  }
  func.func @transform_3(%arg0: i32, %arg1: i32) -> (i32, i32) {
    %c0_i32 = arith.constant 0 : i32
    %c0_i32_0 = arith.constant 0 : i32
    %c0_i32_1 = arith.constant 0 : i32
    return %c0_i32, %c0_i32_0 : i32, i32
  }
  func.func @transform_4(%arg0: i32, %arg1: i32) -> (i32, i32) {
    %c0_i32 = arith.constant 0 : i32
    %c0_i32_0 = arith.constant 0 : i32
    %c0_i32_1 = arith.constant 0 : i32
    return %c0_i32, %c0_i32_0 : i32, i32
  }
  func.func @transform_5(%arg0: i32, %arg1: i32) -> (i32, i32, i32) {
    %c0_i32 = arith.constant 0 : i32
    %c0_i32_0 = arith.constant 0 : i32
    return %arg0, %c0_i32, %arg1 : i32, i32, i32
  }
}

</mosaic_0001>

<bundles_post_ra>
// kernel: tpu_custom_call.1
= control target key start
LH: loop header
LB: loop body
LE: loop exit
PB: predicated region body
PF: predicated region fallthrough
CT: control target
= control target key end

     0   :  { %10 = vsyncpa [#allocation3], 0  ;;  %s1357_s0 = inlined_call_operand.vmem [shape: f32[2,4,512], index: 0, kind: input, shape index: {}]   ;;  %s1358_s1 = inlined_call_operand.hbm [shape: f32[2,4,512], index: 1, kind: input, shape index: {}]   ;;  %s1359_s2 = inlined_call_operand.vmem [shape: f32[16,4], index: 2, kind: input, shape index: {}]   ;;  %s1360_s3 = inlined_call_operand.vmem [shape: f32[16,4], index: 3, kind: input, shape index: {}]   ;;  %s1361_s4 = inlined_call_operand.vmem [shape: f32[16,1], index: 4, kind: input, shape index: {}]   ;;  %s1362_s5 = inlined_call_operand.hbm [shape: f32[2,16,512], index: 5, kind: output, shape index: {}]  }
   0x1   :  { %12 = vsyncpa [#allocation3 + $0x1], 0 }
   0x2   :  { %13 = vsyncpa [#allocation4], 0 }
   0x3   :  { %15 = vsyncpa [#allocation4 + $0x1], 0  ;;  %s1169_s18 = smov 0   ;;  %s1171_s19 = smov 0  }
   0x4   :  { %s1173_s20 = smov 0   ;;  %s1175_s21 = smov 0  }
   0x5   :  { %s1177_s22 = smov 0   ;;  %s1179_s23 = smov 0  }
   0x6 LB: > { %s892_s24 = sadd.s32 4294967295, %s1131_s23   ;;  %s893_s25 = sadd.s32 4294967294, %s1131_s23   ;;  %s1131_s23 = sphi %s1179_s23, %s21_s23   ;;  %s1127_s22 = sphi %s1177_s22, %s1374_s22   ;;  %s1123_s21 = sphi %s1175_s21, %s1373_s21   ;;  %s1119_s20 = sphi %s1173_s20, %s1372_s20   ;;  %s1115_s19 = sphi %s1171_s19, %s1371_s19   ;;  %s1111_s18 = sphi %s1169_s18, %s1370_s18  }
   0x7   : > { %s33_s26 = sadd.s32 1, %s1127_s22  ;;  %s70_s27 = sadd.s32 1, %s1119_s20 }
   0x8   : > { %p35_p0 = scmp.ge.s32.totalorder %s33_s26, 2  ;;  %p77_p1 = scmp.ne.s32.totalorder %s1119_s20, %s1115_s19 }
   0x9   : > { %p78_p2 = scmp.eq.s32.totalorder %s1131_s23, 0  ;;  %p83_p3 = scmp.ne.s32.totalorder %s1115_s19, %s1111_s18 }
   0xa   : > { %s1376_s26 = smov (%p35_p0, %s33_s26), 0  ;;  %p84_p5 = scmp.eq.s32.totalorder %s892_s24, 0 }
   0xb   : > { %p1210_p4 = por %p78_p2, %p77_p1  ;;  %s65_s29 = ssub.s32 %s1127_s22, %s1376_s26 }
   0xc   : > { %p172_p6 = scmp.eq.s32.totalorder %s892_s24, 1  ;;  %p68_p7 = scmp.eq.s32.totalorder %s65_s29, 0 }
   0xd   : > { %p1216_p8 = por %p84_p5, %p83_p3  ;;  %p178_p10 = scmp.eq.s32.totalorder %s893_s25, 1 }
   0xe   : > { %p1220_p9 = por %p172_p6, %p77_p1  ;;  %p940_p13 = scmp.lt.s32.totalorder %s1131_s23, 2 }
   0xf   : > { %s1225_s7 = scalar_select %p68_p7, %s1119_s20, %s70_s27  }
  0x10   : > { %p1227_p11 = por %p178_p10, %p83_p3  ;;  %s220_s9 = sand.u32 1, %s1119_s20  }
  0x11   : > { %s896_s10 = sshll.u32 %s220_s9, 4  ;;  %s925_s11 = sshll.u32 %s1127_s22, 8 }
  0x12   : > { %s1366_s8 = scalar_select %p1227_p11, 1, 0 }
  0x13   : > { %s232_s14 = scalar_lea.hbm %s1358_s1, %s925_s11  ;;  %s224_s15 = scalar_lea.vmem [#allocation2], %s896_s10 }
  0x14   : > { %s234_s16 = sshll.u32 %s224_s15, 4  ;;  %p1240_p0 = pnand %p940_p13, %p1210_p4  ;;  %s235_s16 = int_to_ptr.vmem [resolvable:$true] %s234_s16 }
  0x15   : > { %p899_p1 = scmp.ge.s32.totalorder %s1131_s23, 1  ;;  %p239_p2 = scmp.lt.s32.totalorder %s1131_s23, 3 }
  0x16   : > { %s221_s24 = scalar_lea.sflag [#allocation3], %s220_s9  ;;  %p1025_p3 = pneg %p1240_p0 }
  0x17   : > { %s1036_s25 = scalar_lea.vmem %s235_s16, 256  ;;  %s1133_s27 = smov [#allocation2]  }
  0x18   : > { %p1037_p5 = scmp.ne.s32.totalorder %s235_s16, %s1036_s25  ;;  %s1041_s29 = sshll.u32 %s1133_s27, 4  ;;  %s1042_s29 = int_to_ptr.vmem [resolvable:$false] %s1041_s29 }
  0x19   : > { %s1043_s10 = scalar_lea.vmem %s1042_s29, 512  ;;  %p1044_p10 = scmp.lt.s32.totalorder %s235_s16, %s1042_s29 }
  0x1a   : > { %p1039_p6 = pnand %p1037_p5, %p1025_p3  ;;  %p1045_p12 = scmp.lt.s32.totalorder %s1043_s10, %s1036_s25 }
  0x1c   : > { %p1040_p7 = pneg %p1039_p6  ;;  %p1046_p4 = por %p1045_p12, %p1044_p10 }
  0x1e   : > { %p1047_p13 = pnand %p1046_p4, %p1040_p7 }
  0x20   : > { %1050 = shalt.err (!%p1047_p13)
}
  0x21   : > { %935 = dma.hbm_to_vmem [thread:$0]  (!%p1240_p0), %s232_s14, 256, %s235_s16, %s221_s24  }
  0x22   : > { %p240_p11 = pnand %p899_p1, %p239_p2 }
  0x23   : > { %s1255_s28 = sand.u32 (!%p240_p11), 1, %s1115_s19  }
  0x24   : > { %243 = sbr.rel (%p240_p11) target bundleno = 341 (0x155), region = 40  ;;  %s900_s9 = sshll.u32 (!%p240_p11), %s1255_s28, 4 }
  0x25   : > { %s246_s11 = scalar_lea.sflag (!%p240_p11), [#allocation3], %s1255_s28  ;;  %s249_s12 = scalar_lea.vmem (!%p240_p11), [#allocation2], %s900_s9 }
  0x29   : > { %1102 = dma.done.wait (%p1216_p8), %s246_s11, 256  }
  0x2a   : > { %1104 = vsyncadd (%p1216_p8), %s246_s11, 4294967040  ;;  %p286_p12 = scmp.lt.s32.totalorder %s1123_s21, 1  ;;  %v1134_v0 = vmov 0.0   ;;  %v1135_v1 = vmov 0   ;;  %v303_v2 = vld [vmem:[%s249_s12] sm:$0xff]  ;;  %vm316_vm0 = vcmask 1043456  }
  0x2b   : > { %389 = vmatprep.mubr.f32.mxu0 %v1134_v0  ;;  %466 = vmatprep.mubr.f32.mxu1 %v1134_v0  ;;  %v304_v3 = vld [vmem:[%s249_s12 + $0x8] sm:$0xff]  ;;  %v307_v4 = vcombine.high %v303_v2, %v303_v2  ;;  %v301_v8 = vld [vmem:[%s1360_s3] sm:$0xff]  ;;  %vm309_vm1 = vcmask 31744   ;;  %s901_s16 = sshll.u32 %s1255_s28, 6  ;;  %s1136_s9 = smov [#allocation5]  }
  0x2c   : > { %s287_s13 = scalar_select %p286_p12, %s1123_s21, 1  ;;  %994 = vset.pattern.permute.xlu0 %v1135_v1  ;;  %v308_v5 = vcombine.high %v304_v3, %v304_v3  ;;  %v302_v11 = vld [vmem:[%s1360_s3 + $0x8] sm:$0xff]  ;;  %v651_v12 = vld [vmem:[%s1361_s4] sm:$0xff] }
  0x2d   : > { %904 = vmatprep.subr.msk.mxu0 %vm316_vm0, %v307_v4  ;;  %v297_v13 = vld [vmem:[%s1359_s2] sm:$0xff]  ;;  %655 = vperm.xlu0 %994, %v651_v12   ;;  %v652_v14 = vld [vmem:[%s1361_s4 + $0x8] sm:$0xff]  ;;  %s284_s30 = scalar_lea.vmem [#allocation5], %s901_s16  ;;  %s1055_s11 = sshll.u32 %s1136_s9, 4  ;;  %s1056_s11 = int_to_ptr.vmem [resolvable:$false] %s1055_s11 }
  0x2e   : > { %s926_s14 = sshll.u32 %s287_s13, 4  ;;  %908 = vmatprep.subr.msk.mxu1 %vm316_vm0, %v308_v5  ;;  %905 = vmatpush1.msk.msra.mxu0 %vm316_vm0, %v303_v2  ;;  %v298_v15 = vld [vmem:[%s1359_s2 + $0x8] sm:$0xff]  ;;  %s787_s24 = sshll.u32 %s284_s30, 4  ;;  %s1309_s24 = int_to_ptr.vmem [resolvable:$true] %s787_s24 }
  0x2f   : > { %s293_s17 = scalar_lea.vmem %s1357_s0, %s926_s14  ;;  %909 = vmatpush1.msk.msra.mxu1 %vm316_vm0, %v304_v3  ;;  %906 = vmatmul.mubr.msk.f32.vlgmr.msra.gmra.mxu0 %vm309_vm1, %v301_v8  ;;  %s1051_s10 = scalar_lea.vmem %s1309_s24, 1024 }
  0x30   : > { %v299_v6 = vld [vmem:[%s293_s17] sm:$0xff]  ;;  %v300_v7 = vld [vmem:[%s293_s17 + $0x8] sm:$0xff]  ;;  %910 = vmatmul.mubr.msk.f32.vlgmr.msra.gmra.mxu1 %vm309_vm1, %v301_v8  ;;  %395 = vmatprep.mubr.f32.mxu0 %v1134_v0  ;;  %s927_s17 = sshll.u32 %s1123_s21, 10  ;;  %s772_s21 = scalar_lea.sflag [#allocation4], %s1255_s28 }
  0x31   : > { %v481_v9 = vcombine.high %v299_v6, %v299_v6  ;;  %v482_v10 = vcombine.high %v300_v7, %v300_v7  ;;  %472 = vmatprep.mubr.f32.mxu1 %v1134_v0  ;;  %660 = vperm.xlu0 %994, %v652_v14   ;;  %s1307_s29 = scalar_lea.hbm %s1362_s5, %s927_s17  ;;  %p1052_p8 = scmp.ne.s32.totalorder %s1309_s24, %s1051_s10 }
  0x32   : > { %s1057_s12 = scalar_lea.vmem %s1056_s11, 2048  ;;  %p1058_p1 = scmp.lt.s32.totalorder %s1309_s24, %s1056_s11 }
  0x33   : > { %912 = vmatprep.subr.msk.mxu0 %vm316_vm0, %v481_v9  ;;  %916 = vmatprep.subr.msk.mxu1 %vm316_vm0, %v482_v10  ;;  %p1053_p11 = pnand %p1052_p8, %p1220_p9  ;;  %p1059_p2 = scmp.lt.s32.totalorder %s1057_s12, %s1051_s10 }
  0x34   : > { %913 = vmatpush1.msk.msra.mxu0 %vm316_vm0, %v299_v6  ;;  %917 = vmatpush1.msk.msra.mxu1 %vm316_vm0, %v300_v7 }
  0x35   : > { %907 = vmatmul.mubr.msk.f32.gmra.mxu0 %vm309_vm1, %v302_v11  ;;  %911 = vmatmul.mubr.msk.f32.gmra.mxu1 %vm309_vm1, %v302_v11  ;;  %p1054_p0 = pneg %p1053_p11  ;;  %p1060_p3 = por %p1059_p2, %p1058_p1 }
  0x36   : > { %561 = vmatprep.mubr.f32.mxu0 %v1134_v0  ;;  %638 = vmatprep.mubr.f32.mxu1 %v1134_v0 }
  0x37   : > { %p1061_p5 = pnand %p1060_p3, %p1054_p0 }
  0x39   : > { %914 = vmatmul.mubr.msk.f32.vlgmr.msra.gmra.mxu0 %vm309_vm1, %v297_v13  ;;  %918 = vmatmul.mubr.msk.f32.vlgmr.msra.gmra.mxu1 %vm309_vm1, %v297_v13 }
  0x3a   : > { %567 = vmatprep.mubr.f32.mxu0 %v1134_v0  ;;  %644 = vmatprep.mubr.f32.mxu1 %v1134_v0 }
  0x3d   : > { %915 = vmatmul.mubr.msk.f32.gmra.mxu0 %vm309_vm1, %v298_v15  ;;  %919 = vmatmul.mubr.msk.f32.gmra.mxu1 %vm309_vm1, %v298_v15 }
  0xa8   : > { %v656_v24 = vpop.permute.xlu0 %655 }
  0xac   : > { %v661_v37 = vpop.permute.xlu0 %660 }
  0xef   : > { %v391_v16 = vpop.f32.mrf.mxu0 }
  0xf0   : > { %v468_v17 = vpop.f32.mrf.mxu1 }
  0xf1   : > { %v393_v18 = vpop.f32.mrf.mxu0 }
  0xf2   : > { %v470_v19 = vpop.f32.mrf.mxu1 }
  0xf5   : > { %v397_v20 = vpop.f32.mrf.mxu0  ;;  %v474_v21 = vpop.f32.mrf.mxu1 }
  0xf7   : > { %v399_v22 = vpop.f32.mrf.mxu0  ;;  %v476_v23 = vpop.f32.mrf.mxu1 }
  0xf9   : > { %v563_v25 = vpop.f32.mrf.mxu0  ;;  %v640_v26 = vpop.f32.mrf.mxu1 }
  0xfa   : > { %v564_v27 = vadd.f32 %v563_v25, %v391_v16  ;;  %v641_v28 = vadd.f32 %v640_v26, %v468_v17 }
  0xfb   : > { %v565_v29 = vpop.f32.mrf.mxu0  ;;  %v642_v30 = vpop.f32.mrf.mxu1 }
  0xfc   : > { %v566_v31 = vadd.f32 %v565_v29, %v393_v18  ;;  %v643_v32 = vadd.f32 %v642_v30, %v470_v19  ;;  %v663_v38 = vadd.f32 %v656_v24, %v564_v27  ;;  %v665_v39 = vadd.f32 %v656_v24, %v641_v28 }
  0xfd   : > { %v569_v33 = vpop.f32.mrf.mxu0  ;;  %v646_v34 = vpop.f32.mrf.mxu1 }
  0xfe   : > { %v570_v35 = vadd.f32 %v569_v33, %v397_v20  ;;  %v647_v36 = vadd.f32 %v646_v34, %v474_v21  ;;  %v664_v46 = vadd.f32 %v656_v24, %v566_v31  ;;  %v666_v47 = vadd.f32 %v656_v24, %v643_v32 }
  0xff   : > { %v571_v40 = vpop.f32.mrf.mxu0  ;;  %v648_v41 = vpop.f32.mrf.mxu1 }
 0x100   : > { %v667_v42 = vadd.f32 %v661_v37, %v570_v35  ;;  %v669_v43 = vadd.f32 %v661_v37, %v647_v36  ;;  %v572_v44 = vadd.f32 %v571_v40, %v399_v22  ;;  %v649_v45 = vadd.f32 %v648_v41, %v476_v23 }
 0x102   : > { %v671_v48 = vmax.f32 %v663_v38, %v667_v42  ;;  %v685_v49 = vmax.f32 %v665_v39, %v669_v43  ;;  %v668_v50 = vadd.f32 %v661_v37, %v572_v44  ;;  %v670_v51 = vadd.f32 %v661_v37, %v649_v45 }
 0x104   : > { %v672_v52 = vrot.slane %v671_v48, 4  ;;  %v686_v53 = vrot.slane %v685_v49, 4  ;;  %v678_v54 = vmax.f32 %v664_v46, %v668_v50  ;;  %v692_v55 = vmax.f32 %v666_v47, %v670_v51 }
 0x106   : > { %v673_v56 = vmax.f32 %v671_v48, %v672_v52  ;;  %v687_v57 = vmax.f32 %v685_v49, %v686_v53  ;;  %v679_v58 = vrot.slane %v678_v54, 4  ;;  %v693_v59 = vrot.slane %v692_v55, 4 }
 0x108   : > { %v674_v60 = vrot.slane %v673_v56, 2  ;;  %v688_v61 = vrot.slane %v687_v57, 2  ;;  %v680_v62 = vmax.f32 %v678_v54, %v679_v58  ;;  %v694_v63 = vmax.f32 %v692_v55, %v693_v59 }
 0x10a   : > { %v675_v0 = vmax.f32 %v673_v56, %v674_v60  ;;  %v689_v1 = vmax.f32 %v687_v57, %v688_v61  ;;  %v681_v2 = vrot.slane %v680_v62, 2  ;;  %v695_v3 = vrot.slane %v694_v63, 2 }
 0x10c   : > { %v676_v4 = vrot.slane %v675_v0, 1  ;;  %v690_v5 = vrot.slane %v689_v1, 1  ;;  %v682_v6 = vmax.f32 %v680_v62, %v681_v2  ;;  %v696_v7 = vmax.f32 %v694_v63, %v695_v3 }
 0x10e   : > { %v677_v8 = vmax.f32 %v675_v0, %v676_v4  ;;  %v691_v9 = vmax.f32 %v689_v1, %v690_v5  ;;  %v683_v10 = vrot.slane %v682_v6, 1  ;;  %v697_v11 = vrot.slane %v696_v7, 1 }
 0x110   : > { %v699_v12 = vsub.f32 %v663_v38, %v677_v8  ;;  %v701_v13 = vsub.f32 %v665_v39, %v691_v9  ;;  %v703_v14 = vsub.f32 %v667_v42, %v677_v8  ;;  %v705_v15 = vsub.f32 %v669_v43, %v691_v9 }
 0x111   : > { %v684_v16 = vmax.f32 %v682_v6, %v683_v10  ;;  %v698_v17 = vmax.f32 %v696_v7, %v697_v11 }
 0x112   : > { %v707_v18 = vmul.f32 1.442695, %v699_v12  ;;  %v711_v19 = vmul.f32 1.442695, %v701_v13  ;;  %v715_v20 = vmul.f32 1.442695, %v703_v14 }
 0x113   : > { %v719_v21 = vmul.f32 1.442695, %v705_v15  ;;  %v700_v22 = vsub.f32 %v664_v46, %v684_v16  ;;  %v704_v23 = vsub.f32 %v668_v50, %v684_v16  ;;  %v702_v24 = vsub.f32 %v666_v47, %v698_v17 }
 0x114   : > { %999 = vpow2.f32 %v707_v18  ;;  %v706_v25 = vsub.f32 %v670_v51, %v698_v17 }
 0x115   : > { %1001 = vpow2.f32 %v711_v19  ;;  %v709_v26 = vmul.f32 1.442695, %v700_v22  ;;  %v717_v27 = vmul.f32 1.442695, %v704_v23  ;;  %v713_v28 = vmul.f32 1.442695, %v702_v24 }
 0x116   : > { %1003 = vpow2.f32 %v715_v20  ;;  %v721_v29 = vmul.f32 1.442695, %v706_v25 }
 0x117   : > { %1005 = vpow2.f32 %v719_v21 }
 0x118   : > { %1007 = vpow2.f32 %v709_v26 }
 0x119   : > { %1009 = vpow2.f32 %v717_v27 }
 0x11a   : > { %1011 = vpow2.f32 %v713_v28 }
 0x11b   : > { %1013 = vpow2.f32 %v721_v29 }
 0x121   : > { %v1000_v30 = vpop.eup %999 }
 0x122   : > { %v1002_v31 = vpop.eup %1001 }
 0x123   : > { %v1004_v32 = vpop.eup %1003 }
 0x124   : > { %v1006_v33 = vpop.eup %1005  ;;  %v723_v34 = vadd.f32 %v1004_v32, %v1000_v30 }
 0x125   : > { %v1008_v35 = vpop.eup %1007  ;;  %v737_v36 = vadd.f32 %v1006_v33, %v1002_v31 }
 0x126   : > { %v1010_v37 = vpop.eup %1009  ;;  %v724_v38 = vrot.slane %v723_v34, 4 }
 0x127   : > { %v1012_v39 = vpop.eup %1011  ;;  %v738_v40 = vrot.slane %v737_v36, 4  ;;  %v730_v41 = vadd.f32 %v1010_v37, %v1008_v35 }
 0x128   : > { %v1014_v42 = vpop.eup %1013  ;;  %v725_v43 = vadd.f32 %v724_v38, %v723_v34 }
 0x129   : > { %v739_v44 = vadd.f32 %v738_v40, %v737_v36  ;;  %v731_v45 = vrot.slane %v730_v41, 4  ;;  %v744_v46 = vadd.f32 %v1014_v42, %v1012_v39 }
 0x12a   : > { %v726_v47 = vrot.slane %v725_v43, 2 }
 0x12b   : > { %v740_v48 = vrot.slane %v739_v44, 2  ;;  %v732_v49 = vadd.f32 %v731_v45, %v730_v41  ;;  %v745_v50 = vrot.slane %v744_v46, 4 }
 0x12c   : > { %v727_v51 = vadd.f32 %v726_v47, %v725_v43 }
 0x12d   : > { %v741_v52 = vadd.f32 %v740_v48, %v739_v44  ;;  %v733_v53 = vrot.slane %v732_v49, 2  ;;  %v746_v54 = vadd.f32 %v745_v50, %v744_v46 }
 0x12e   : > { %v728_v55 = vrot.slane %v727_v51, 1 }
 0x12f   : > { %v742_v56 = vrot.slane %v741_v52, 1  ;;  %v734_v57 = vadd.f32 %v733_v53, %v732_v49  ;;  %v747_v58 = vrot.slane %v746_v54, 2 }
 0x130   : > { %v729_v59 = vadd.f32 %v728_v55, %v727_v51 }
 0x131   : > { %v743_v60 = vadd.f32 %v742_v56, %v741_v52  ;;  %v735_v61 = vrot.slane %v734_v57, 1  ;;  %v748_v62 = vadd.f32 %v747_v58, %v746_v54 }
 0x132   : > { %1015 = vrcp.f32 %v729_v59 }
 0x133   : > { %1017 = vrcp.f32 %v743_v60  ;;  %v736_v63 = vadd.f32 %v735_v61, %v734_v57  ;;  %v749_v0 = vrot.slane %v748_v62, 1 }
 0x135   : > { %1019 = vrcp.f32 %v736_v63  ;;  %v750_v1 = vadd.f32 %v749_v0, %v748_v62 }
 0x137   : > { %1021 = vrcp.f32 %v750_v1 }
 0x13f   : > { %v1016_v2 = vpop.eup %1015 }
 0x140   : > { %v1018_v3 = vpop.eup %1017  ;;  %v755_v4 = vmul.f32 %v1016_v2, %v1000_v30  ;;  %v759_v5 = vmul.f32 %v1016_v2, %v1004_v32 }
 0x141   : > { %v757_v6 = vmul.f32 %v1018_v3, %v1002_v31  ;;  %v761_v7 = vmul.f32 %v1018_v3, %v1006_v33 }
 0x142   : > { %v1020_v8 = vpop.eup %1019  ;;  %763 = vst [vmem:[%s284_s30] sm:$0xff] %v755_v4  ;;  %767 = vst [vmem:[%s284_s30 + $0x20] sm:$0xff] %v759_v5 }
 0x143   : > { %765 = vst [vmem:[%s284_s30 + $0x10] sm:$0xff] %v757_v6  ;;  %769 = vst [vmem:[%s284_s30 + $0x30] sm:$0xff] %v761_v7  ;;  %v756_v9 = vmul.f32 %v1020_v8, %v1008_v35  ;;  %v760_v10 = vmul.f32 %v1020_v8, %v1010_v37 }
 0x144   : > { %v1022_v11 = vpop.eup %1021 }
 0x145   : > { %764 = vst [vmem:[%s284_s30 + $0x8] sm:$0xff] %v756_v9  ;;  %768 = vst [vmem:[%s284_s30 + $0x28] sm:$0xff] %v760_v10  ;;  %v758_v12 = vmul.f32 %v1022_v11, %v1012_v39  ;;  %v762_v13 = vmul.f32 %v1022_v11, %v1014_v42 }
 0x147   : > { %766 = vst [vmem:[%s284_s30 + $0x18] sm:$0xff] %v758_v12  ;;  %770 = vst [vmem:[%s284_s30 + $0x38] sm:$0xff] %v762_v13 }
 0x148   : > { %1064 = shalt.err (!%p1061_p5)
}
 0x149   : > { %s1065_s13 = scalar_lea.hbm %s1307_s29, 1024  ;;  %s1069_s16 = scalar_lea.hbm %s1362_s5, 2048 }
 0x14a   : > { %p1066_p6 = scmp.ne.s32.totalorder %s1307_s29, %s1065_s13  ;;  %p1070_p4 = scmp.lt.s32.totalorder %s1307_s29, %s1362_s5 }
 0x14b   : > { %p1071_p13 = scmp.lt.s32.totalorder %s1069_s16, %s1065_s13 }
 0x14c   : > { %p1067_p7 = pnand %p1066_p6, %p1220_p9 }
 0x14d   : > { %p1072_p12 = por %p1071_p13, %p1070_p4 }
 0x14e   : > { %p1068_p10 = pneg %p1067_p7 }
 0x150   : > { %p1073_p8 = pnand %p1072_p12, %p1068_p10 }
 0x152   : > { %1076 = shalt.err (!%p1073_p8)
}
 0x153   : > { %s1137_s25 = smov 512   ;;  %s1138_s27 = smov 32  }
 0x154   : > { %930 = dma.vmem_to_hbm [thread:$0]  (%p1220_p9), %s1309_s24, 1024, %s1307_s29, %s772_s21, %s1137_s25, %s1137_s25, %s1138_s27  }
 0x155 PF: > { %s802_s10 = sand.u32 1, %s1111_s18   ;;  %p1368_p11 = scmp.ne.s32.totalorder %s1366_s8, 0 }
 0x156   : > { %p1369_p0 = scmp.ge.s32.totalorder %s1131_s23, 2  ;;  %s803_s9 = scalar_lea.sflag [#allocation4], %s802_s10 }
 0x158   : > { %p937_p1 = pnand %p1369_p0, %p1368_p11 }
 0x15a   : > { %p938_p2 = pneg %p937_p1 }
 0x15c   : > { %1106 = dma.done.wait (%p938_p2), %s803_s9, 1024  }
 0x15d   : > { %1108 = vsyncadd (%p938_p2), %s803_s9, 4294966272  ;;  %s21_s23 = sadd.s32 1, %s1131_s23   ;;  %s1370_s18 = smov %s1115_s19 }
 0x15e   : > { %p18_p3 = scmp.ge.s32.totalorder %s21_s23, 4   ;;  %s1371_s19 = smov %s1119_s20 }
 0x15f   : > { %s1372_s20 = smov %s1225_s7  ;;  %s1373_s21 = smov %s1127_s22 }
 0x160   : > { %s1374_s22 = smov %s1376_s26  ;;  %20 = sbr.rel (!%p18_p3) target bundleno = 6 (0x6), region = 88 }
 0x165   :  { %808 = vsyncpa [#allocation3], 1 }
 0x166   :  { %810 = vsyncpa [#allocation3 + $0x1], 1 }
 0x167   :  { %811 = vsyncpa [#allocation4], 1 }
 0x168   :  { %813 = vsyncpa [#allocation4 + $0x1], 1 }

</bundles_post_ra>
